<compile_context>
chip_gen: v7x
topology: tpu7x:2x2x1
jax: 0.10.0
libtpu: 0.0.40
codegen_flags: <defaults>
</compile_context>

<pallas_src>
import functools

import jax
import jax.numpy as jnp
from jax.experimental import pallas as pl
from jax.experimental.pallas import tpu as pltpu


# ----------------------------------------------------------------------------
# Kernel: one lane-dense output tile per grid step.
# ----------------------------------------------------------------------------
def _bnn_matmul_kernel(x_ref, w_ref, s_ref, o_ref):
    # x_ref: (1, KC, TL)   im2col patches (compute dtype), lane-dense tile
    # w_ref: (C_out, KC)   sign(W), exactly +/-1 (compute dtype, resident)
    # s_ref: (C_out, 1)    per-output-channel mean|W| scale, f32 (resident)
    # o_ref: (1, C_out, TL) output tile (lane width = TL, multiple of 128)
    acc = jax.lax.dot_general(
        w_ref[...], x_ref[0],
        dimension_numbers=(((1,), (0,)), ((), ())),
        preferred_element_type=jnp.float32)              # (C_out, TL) f32
    o_ref[0] = (acc * s_ref[...]).astype(o_ref.dtype)    # exact f32 scale


# ----------------------------------------------------------------------------
# Generation-aware VMEM / tile planning.
# ----------------------------------------------------------------------------
def _vmem_plan():
    try:
        cap = int(pltpu.get_tpu_info().vmem_capacity_bytes)
    except Exception:  # pragma: no cover - conservative fallback
        cap = 128 << 20
    if cap <= (64 << 20):          # v7x-class: 64 MiB per TensorCore
        limit = 40 << 20
    else:                          # v5e / v6e: 128 MiB physical
        limit = 100 << 20
    # Headroom for Mosaic internal scratch + resident weight/scale blocks.
    return limit, limit - (8 << 20)


def _pick_spatial_tile(l_out_pad, kc, c_out, in_dtype, out_dtype, budget):
    in_b = jnp.dtype(in_dtype).itemsize
    out_b = jnp.dtype(out_dtype).itemsize
    for cand in (2048, 1024, 512, 256, 128):
        if l_out_pad % cand:
            continue
        # Double-buffered x and out tiles per step.
        per_step = 2 * cand * (kc * in_b + c_out * out_b)
        if per_step <= budget:
            return cand
    return 128  # l_out_pad is always a multiple of 128


# ----------------------------------------------------------------------------
# Wrapper: binarize weights, im2col, pad to lane-dense tiles, launch kernel.
# ----------------------------------------------------------------------------
def bnn_conv1d(x, weight, *, stride=1, padding=0, compute_dtype=jnp.bfloat16):
    """x: (N, C_in, L); weight: (C_out, C_in, K) -> (N, C_out, L_out)."""
    n, c_in, l = x.shape
    c_out, c_in_w, k = weight.shape
    assert c_in == c_in_w
    l_out = (l + 2 * padding - k) // stride + 1
    assert l_out >= 1
    kc = k * c_in

    # Per-output-channel scale stays f32 and is applied after the dot, so the
    # weight side of the matmul is exact (+/-1) even with bf16 operands.
    scale = jnp.mean(jnp.abs(weight), axis=(1, 2)).reshape(c_out, 1)
    scale = scale.astype(jnp.float32)
    w_sign = jnp.sign(weight)                                     # exact in bf16
    # Tap-major folding matching the patch layout: w_flat[o, kk*C_in + i].
    w_flat = jnp.transpose(w_sign, (0, 2, 1)).reshape(c_out, kc)
    w_flat = w_flat.astype(compute_dtype)

    # Wrapper-side zero padding + im2col (one-time layout plumbing).  For
    # stride > 1 the decimation happens here, so in-kernel reads are contiguous.
    x_pad = x if padding == 0 else jnp.pad(
        x, ((0, 0), (0, 0), (padding, padding)))
    span = (l_out - 1) * stride + 1
    cols = [x_pad[:, :, kk:kk + span:stride] for kk in range(k)]
    patches = cols[0] if k == 1 else jnp.concatenate(cols, axis=1)  # (N, KC, L_out)

    # Pad L_out up to a multiple of 128 -> every output tile store is lane-dense.
    l_out_pad = ((l_out + 127) // 128) * 128
    if l_out_pad != l_out:
        patches = jnp.pad(patches, ((0, 0), (0, 0), (0, l_out_pad - l_out)))
    patches = patches.astype(compute_dtype)

    out_dtype = x.dtype
    vmem_limit, tile_budget = _vmem_plan()
    tl = _pick_spatial_tile(l_out_pad, kc, c_out, patches.dtype, out_dtype,
                            tile_budget)
    num_lt = l_out_pad // tl

    y_pad = pl.pallas_call(
        _bnn_matmul_kernel,
        out_shape=jax.ShapeDtypeStruct((n, c_out, l_out_pad), out_dtype),
        grid=(n, num_lt),
        in_specs=[
            # Tiled im2col patches: (1, KC, TL) per step (double-buffered).
            pl.BlockSpec((1, kc, tl), lambda b, lt: (b, 0, lt)),
            # Resident +/-1 weight matrix and f32 scale (tiny).
            pl.BlockSpec((c_out, kc), lambda b, lt: (0, 0)),
            pl.BlockSpec((c_out, 1), lambda b, lt: (0, 0)),
        ],
        out_specs=pl.BlockSpec((1, c_out, tl), lambda b, lt: (b, 0, lt)),
        compiler_params=pltpu.CompilerParams(
            dimension_semantics=("parallel", "parallel"),
            vmem_limit_bytes=vmem_limit),
    )(patches, w_flat, scale)

    return y_pad[:, :, :l_out]


# ----------------------------------------------------------------------------
# Pure-JAX reference matching the PyTorch forward.
# ----------------------------------------------------------------------------
def _reference(x, weight, *, stride, padding):
    scaling = jnp.mean(jnp.mean(jnp.abs(weight), axis=2, keepdims=True),
                       axis=1, keepdims=True)
    bw = scaling * jnp.sign(weight)
    return jax.lax.conv_general_dilated(
        x, bw, window_strides=(stride,), padding=[(padding, padding)],
        dimension_numbers=("NCH", "OIH", "NCH"))


if __name__ == "__main__":
    # Module config (synthetic, deterministic init mirroring torch.rand*0.001).
    in_channels, out_channels, kernel_size = 4, 8, 3
    N, L = 2, 16

    key = jax.random.PRNGKey(0)
    kw, kx = jax.random.split(key)
    weight = jax.random.uniform(
        kw, (out_channels, in_channels, kernel_size), dtype=jnp.float32) * 0.001
    x = jax.random.normal(kx, (N, in_channels, L), dtype=jnp.float32)

    # ---- stride=1, padding=1, exact-precision (f32) path -------------------
    y_ref = _reference(x, weight, stride=1, padding=1)
    y = bnn_conv1d(x, weight, stride=1, padding=1, compute_dtype=jnp.float32)
    y = jax.block_until_ready(y)
    assert y.shape == y_ref.shape, (y.shape, y_ref.shape)
    assert jnp.max(jnp.abs(y - y_ref)) < 5e-5

    # ---- stride=2 path (wrapper-side decimation), f32 -----------------------
    y_ref_s2 = _reference(x, weight, stride=2, padding=1)
    y_s2 = bnn_conv1d(x, weight, stride=2, padding=1,
                      compute_dtype=jnp.float32)
    y_s2 = jax.block_until_ready(y_s2)
    assert y_s2.shape == y_ref_s2.shape, (y_s2.shape, y_ref_s2.shape)
    assert jnp.max(jnp.abs(y_s2 - y_ref_s2)) < 5e-5

    # ---- default bf16-operand path (exact +/-1 weights, f32 scale/accum) ----
    y_bf16 = bnn_conv1d(x, weight, stride=1, padding=1)
    y_bf16 = jax.block_until_ready(y_bf16)
    assert y_bf16.shape == y_ref.shape
    assert jnp.max(jnp.abs(y_bf16 - y_ref)) < 3e-4   # only x rounding remains

    print("KERNEL_OK")
</pallas_src>

<mosaic_0001>
module attributes {stable_mosaic.version = 11 : i64} {
  func.func @_bnn_matmul_kernel(%arg0: i32, %arg1: i32, %arg2: memref<1x12x128xf32, #tpu.memory_space<vmem>>, %arg3: memref<8x12xf32, #tpu.memory_space<vmem>>, %arg4: memref<8x1xf32, #tpu.memory_space<vmem>>, %arg5: memref<1x8x128xf32, #tpu.memory_space<vmem>>) attributes {dimension_semantics = [#tpu.dimension_semantics<parallel>, #tpu.dimension_semantics<parallel>], iteration_bounds = array<i64: 2, 1>, scalar_prefetch = 0 : i64, scratch_operands = 0 : i64, tpu.core_type = #tpu.core_type<tc>, window_params = [{transform_indices = @transform_0, window_bounds = array<i64: 1, 12, 128>}, {pipeline_mode = #tpu.pipeline_mode<synchronous>, transform_indices = @transform_1, window_bounds = array<i64: 8, 12>}, {pipeline_mode = #tpu.pipeline_mode<synchronous>, transform_indices = @transform_2, window_bounds = array<i64: 8, 1>}, {transform_indices = @transform_3, window_bounds = array<i64: 1, 8, 128>}]} {
    %c0 = arith.constant 0 : index
    %c0_0 = arith.constant 0 : index
    %0 = vector.load %arg3[%c0, %c0_0] : memref<8x12xf32, #tpu.memory_space<vmem>>, vector<8x12xf32>
    %c0_1 = arith.constant 0 : index
    %c0_2 = arith.constant 0 : index
    %c0_3 = arith.constant 0 : index
    %1 = vector.load %arg2[%c0_1, %c0_2, %c0_3] : memref<1x12x128xf32, #tpu.memory_space<vmem>>, vector<1x12x128xf32>
    %2 = vector.shape_cast %1 : vector<1x12x128xf32> to vector<12x128xf32>
    %cst = arith.constant dense<0.000000e+00> : vector<8x128xf32>
    %3 = tpu.matmul %0, %2, %cst {dimension_numbers = #tpu.dot_dimension_numbers<[1], [0], [0], [1], [0, 0, 1, 1], [], []>} : vector<8x12xf32>, vector<12x128xf32>, vector<8x128xf32> -> vector<8x128xf32>
    %c0_4 = arith.constant 0 : index
    %c0_5 = arith.constant 0 : index
    %4 = vector.load %arg4[%c0_4, %c0_5] : memref<8x1xf32, #tpu.memory_space<vmem>>, vector<8x1xf32>
    %5 = vector.broadcast %4 : vector<8x1xf32> to vector<8x128xf32>
    %6 = arith.mulf %3, %5 : vector<8x128xf32>
    %c0_6 = arith.constant 0 : index
    %c0_7 = arith.constant 0 : index
    %c0_8 = arith.constant 0 : index
    %7 = vector.load %arg5[%c0_6, %c0_7, %c0_8] : memref<1x8x128xf32, #tpu.memory_space<vmem>>, vector<1x8x128xf32>
    %8 = vector.shape_cast %7 : vector<1x8x128xf32> to vector<8x128xf32>
    %9 = vector.shape_cast %6 : vector<8x128xf32> to vector<1x8x128xf32>
    tpu.vector_store %arg5[%c0_6, %c0_7, %c0_8], %9 {strides = array<i32>} : memref<1x8x128xf32, #tpu.memory_space<vmem>>, vector<1x8x128xf32>,
    return
  }
  func.func @transform_0(%arg0: i32, %arg1: i32) -> (i32, i32, i32) {
    %c0_i32 = arith.constant 0 : i32
    %c0_i32_0 = arith.constant 0 : i32
    return %arg0, %c0_i32, %arg1 : i32, i32, i32
  }
  func.func @transform_1(%arg0: i32, %arg1: i32) -> (i32, i32) {
    %c0_i32 = arith.constant 0 : i32
    %c0_i32_0 = arith.constant 0 : i32
    %c0_i32_1 = arith.constant 0 : i32
    return %c0_i32, %c0_i32_0 : i32, i32
  }
  func.func @transform_2(%arg0: i32, %arg1: i32) -> (i32, i32) {
    %c0_i32 = arith.constant 0 : i32
    %c0_i32_0 = arith.constant 0 : i32
    %c0_i32_1 = arith.constant 0 : i32
    return %c0_i32, %c0_i32_0 : i32, i32
  }
  func.func @transform_3(%arg0: i32, %arg1: i32) -> (i32, i32, i32) {
    %c0_i32 = arith.constant 0 : i32
    %c0_i32_0 = arith.constant 0 : i32
    return %arg0, %c0_i32, %arg1 : i32, i32, i32
  }
}

</mosaic_0001>

<bundles_post_ra>
// kernel: tpu_custom_call.1
= control target key start
LH: loop header
LB: loop body
LE: loop exit
PB: predicated region body
PF: predicated region fallthrough
CT: control target
= control target key end

     0   :  { %8 = vsyncpa [#allocation3], 0  ;;  %s1013_s0 = inlined_call_operand.hbm [shape: f32[2,12,128], index: 0, kind: input, shape index: {}]   ;;  %s1014_s1 = inlined_call_operand.hbm [shape: f32[8,12], index: 1, kind: input, shape index: {}]   ;;  %s1015_s2 = inlined_call_operand.hbm [shape: f32[8,1], index: 2, kind: input, shape index: {}]   ;;  %s1016_s3 = inlined_call_operand.hbm [shape: f32[2,8,128], index: 3, kind: output, shape index: {}]  }
   0x1   :  { %10 = vsyncpa [#allocation3 + $0x1], 0 }
   0x2   :  { %11 = vsyncpa [#allocation6], 0 }
   0x3   :  { %12 = vsyncpa [#allocation4], 0 }
   0x4   :  { %14 = vsyncpa [#allocation4 + $0x1], 0  ;;  %s766_s12 = smov 0   ;;  %s768_s13 = smov 0  }
   0x5   :  { %s770_s14 = smov 0   ;;  %s772_s15 = smov 0  }
   0x6   :  { %s774_s16 = smov 0   ;;  %s776_s17 = smov 0  }
   0x7 LB: > { %s435_s18 = sadd.s32 4294967295, %s733_s17   ;;  %s436_s19 = sadd.s32 4294967294, %s733_s17   ;;  %s733_s17 = sphi %s776_s17, %s20_s17   ;;  %s729_s16 = sphi %s774_s16, %s1042_s16   ;;  %s725_s15 = sphi %s772_s15, %s1041_s15   ;;  %s721_s14 = sphi %s770_s14, %s1040_s14   ;;  %s717_s13 = sphi %s768_s13, %s1039_s13   ;;  %s713_s12 = sphi %s766_s12, %s1038_s12  }
   0x8   : > { %s41_s20 = sadd.s32 1, %s721_s14  ;;  %p48_p0 = scmp.ne.s32.totalorder %s721_s14, %s717_s13 }
   0x9   : > { %p49_p1 = scmp.eq.s32.totalorder %s733_s17, 0  ;;  %p54_p2 = scmp.ne.s32.totalorder %s717_s13, %s713_s12 }
   0xa   : > { %p804_p3 = scmp.eq.s32.totalorder %s435_s18, 0  ;;  %p122_p4 = scmp.eq.s32.totalorder %s435_s18, 1 }
   0xb   : > { %p808_p5 = por %p49_p1, %p48_p0  ;;  %p128_p6 = scmp.eq.s32.totalorder %s436_s19, 1 }
   0xc   : > { %s1023_s21 = scalar_select %p804_p3, 1, 0 }
   0xd   : > { %p814_p7 = por %p804_p3, %p54_p2  ;;  %p818_p8 = por %p122_p4, %p48_p0 }
   0xe   : > { %p822_p9 = por %p128_p6, %p54_p2  ;;  %p437_p10 = scmp.ge.s32.totalorder %s733_s17, 1 }
   0xf   : > { %s1025_s23 = scalar_select %p814_p7, 1, 0 }
  0x10   : > { %s1026_s24 = scalar_select %p818_p8, 1, 0 }
  0x11   : > { %s1027_s25 = scalar_select %p822_p9, 1, 0 }
  0x12   : > { %p135_p11 = scmp.lt.s32.totalorder %s733_s17, 3  ;;  %s735_s27 = smov [#allocation5]  }
  0x13   : > { %s148_s28 = sshll.u32 %s735_s27, 4  ;;  %p499_p1 = scmp.lt.s32.totalorder %s733_s17, 2  ;;  %s149_s28 = int_to_ptr.vmem [resolvable:$true] %s148_s28 }
  0x14   : > { %p829_p13 = pnand %p437_p10, %p135_p11  ;;  %s736_s30 = smov [#allocation7]  }
  0x15   : > { %p838_p4 = pnand %p499_p1, %p808_p5  ;;  %s159_s4 = sshll.u32 %s736_s30, 4  ;;  %s848_s4 = int_to_ptr.vmem [resolvable:$true] %s159_s4 }
  0x16   : > { %s1028_s26 = scalar_select %p829_p13, 1, 0 }
  0x17   : > { %p482_p0 = pneg %p829_p13  ;;  %s561_s8 = scalar_lea.hbm %s1014_s1, 128 }
  0x18   : > { %s1029_s29 = scalar_select %p838_p4, 1, 0 }
  0x19   : > { %p844_p2 = pnand %p482_p0, %p804_p3  ;;  %p562_p5 = scmp.ne.s32.totalorder %s1014_s1, %s561_s8 }
  0x1a   : > { %p568_p1 = scmp.lt.u32.totalorder %s561_s8, %s1014_s1 }
  0x1b   : > { %p563_p6 = pneg %p844_p2 }
  0x1d   : > { %p564_p10 = pnand %p563_p6, %p562_p5 }
  0x1f   : > { %p565_p11 = pneg %p564_p10 }
  0x21   : > { %p570_p0 = pnand %p568_p1, %p565_p11 }
  0x23   : > { %573 = shalt.err (!%p570_p0)
}
  0x24   : > { %s574_s19 = scalar_lea.vmem %s149_s28, 128  ;;  %p582_p3 = scmp.lt.s32.totalorder %s149_s28, %s149_s28 }
  0x25   : > { %p575_p12 = scmp.ne.s32.totalorder %s149_s28, %s574_s19  ;;  %p583_p7 = scmp.lt.s32.totalorder %s574_s19, %s574_s19 }
  0x27   : > { %p577_p9 = pnand %p575_p12, %p563_p6  ;;  %p584_p13 = por %p583_p7, %p582_p3 }
  0x29   : > { %p578_p8 = pneg %p577_p9 }
  0x2b   : > { %p585_p4 = pnand %p584_p13, %p578_p8 }
  0x2d   : > { %588 = shalt.err (!%p585_p4)
}
  0x2e   : > { %485 = dma.hbm_to_vmem [thread:$0]  (!%p844_p2), %s1014_s1, 128, %s149_s28, [#allocation6]  }
  0x2f   : > { %s589_s7 = scalar_lea.hbm %s1015_s2, 128 }
  0x30   : > { %p590_p9 = scmp.ne.s32.totalorder %s1015_s2, %s589_s7  ;;  %p596_p8 = scmp.lt.u32.totalorder %s589_s7, %s1015_s2 }
  0x32   : > { %p592_p3 = pnand %p590_p9, %p563_p6 }
  0x34   : > { %p593_p7 = pneg %p592_p3 }
  0x36   : > { %p598_p12 = pnand %p596_p8, %p593_p7 }
  0x38   : > { %601 = shalt.err (!%p598_p12)
}
  0x39   : > { %s602_s28 = scalar_lea.vmem %s848_s4, 128  ;;  %p610_p10 = scmp.lt.s32.totalorder %s848_s4, %s848_s4 }
  0x3a   : > { %p603_p13 = scmp.ne.s32.totalorder %s848_s4, %s602_s28  ;;  %p611_p11 = scmp.lt.s32.totalorder %s602_s28, %s602_s28 }
  0x3c   : > { %p605_p4 = pnand %p603_p13, %p563_p6  ;;  %p612_p1 = por %p611_p11, %p610_p10 }
  0x3e   : > { %p606_p5 = pneg %p605_p4 }
  0x40   : > { %p613_p0 = pnand %p612_p1, %p606_p5 }
  0x42   : > { %616 = shalt.err (!%p613_p0)
}
  0x43   : > { %488 = dma.hbm_to_vmem [thread:$0]  (!%p844_p2), %s1015_s2, 128, %s848_s4, [#allocation6]  }
  0x44   : > { %s32_s22 = sadd.s32 1, %s729_s16  ;;  %s170_s27 = sand.u32 1, %s721_s14  }
  0x45   : > { %p34_p6 = scmp.ge.s32.totalorder %s32_s22, 2  ;;  %s441_s30 = sshll.u32 %s170_s27, 4 }
  0x46   : > { %s455_s6 = sshll.u32 %s729_s16, 8  ;;  %s174_s4 = scalar_lea.vmem [#allocation2], %s441_s30 }
  0x47   : > { %s1044_s22 = smov (%p34_p6, %s32_s22), 0  ;;  %s905_s8 = scalar_lea.hbm %s1013_s0, %s455_s6 }
  0x48   : > { %s36_s9 = ssub.s32 %s729_s16, %s1044_s22  ;;  %s182_s10 = sshll.u32 %s174_s4, 4  ;;  %s909_s10 = int_to_ptr.vmem [resolvable:$true] %s182_s10 }
  0x49   : > { %p39_p2 = scmp.eq.s32.totalorder %s36_s9, 0  ;;  %s916_s28 = scalar_lea.sflag [#allocation3], %s170_s27 }
  0x4a   : > { %s617_s18 = scalar_lea.hbm %s905_s8, 256  ;;  %p1031_p3 = scmp.ne.s32.totalorder %s1029_s29, 0 }
  0x4b   : > { %s914_s11 = scalar_select %p39_p2, %s721_s14, %s41_s20  }
  0x4c   : > { %p618_p9 = scmp.ne.s32.totalorder %s905_s8, %s617_s18  ;;  %p619_p7 = pneg %p1031_p3 }
  0x4d   : > { %s622_s30 = scalar_lea.hbm %s1013_s0, 512  ;;  %p623_p13 = scmp.lt.u32.totalorder %s905_s8, %s1013_s0 }
  0x4e   : > { %p620_p8 = pnand %p619_p7, %p618_p9  ;;  %p624_p4 = scmp.lt.u32.totalorder %s622_s30, %s617_s18 }
  0x4f   : > { %p626_p10 = scmp.lt.u32.totalorder %s617_s18, %s905_s8 }
  0x50   : > { %p621_p12 = pneg %p620_p8  ;;  %p625_p5 = por %p624_p4, %p623_p13 }
  0x52   : > { %p627_p11 = por %p626_p10, %p625_p5 }
  0x54   : > { %p628_p1 = pnand %p627_p11, %p621_p12 }
  0x56   : > { %631 = shalt.err (!%p628_p1)
}
  0x57   : > { %s632_s20 = scalar_lea.vmem %s909_s10, 256  ;;  %s737_s27 = smov [#allocation2]  }
  0x58   : > { %p633_p0 = scmp.ne.s32.totalorder %s909_s10, %s632_s20  ;;  %s637_s9 = sshll.u32 %s737_s27, 4  ;;  %s638_s9 = int_to_ptr.vmem [resolvable:$false] %s637_s9 }
  0x59   : > { %s639_s4 = scalar_lea.vmem %s638_s9, 512  ;;  %p640_p9 = scmp.lt.s32.totalorder %s909_s10, %s638_s9 }
  0x5a   : > { %p635_p6 = pnand %p633_p0, %p619_p7  ;;  %p641_p8 = scmp.lt.s32.totalorder %s639_s4, %s632_s20 }
  0x5c   : > { %p636_p2 = pneg %p635_p6  ;;  %p642_p13 = por %p641_p8, %p640_p9 }
  0x5e   : > { %p643_p4 = pnand %p642_p13, %p636_p2 }
  0x60   : > { %646 = shalt.err (!%p643_p4)
}
  0x61   : > { %s738_s18 = smov 128   ;;  %s739_s19 = smov 8  }
  0x62   : > { %492 = dma.hbm_to_vmem [thread:$0]  (!%p1031_p3), %s905_s8, 256, %s909_s10, %s916_s28, %s738_s18, %s738_s18, %s739_s19  }
  0x63   : > { %p1032_p7 = scmp.ne.s32.totalorder %s1028_s26, 0 }
  0x64   : > { %s947_s6 = sand.u32 (!%p1032_p7), 1, %s717_s13   ;;  %p1033_p12 = scmp.ne.s32.totalorder (!%p1032_p7), %s1025_s23, 0 }
  0x65   : > { %194 = sbr.rel (%p1032_p7) target bundleno = 347 (0x15b), region = 32  ;;  %s445_s30 = sshll.u32 (!%p1032_p7), %s947_s6, 4 }
  0x66   : > { %s197_s5 = scalar_lea.sflag (!%p1032_p7), [#allocation3], %s947_s6  ;;  %s200_s7 = scalar_lea.vmem (!%p1032_p7), [#allocation2], %s445_s30 }
  0x6c   : > { %700 = dma.done.wait (%p1033_p12), %s197_s5, 256  }
  0x6d   : > { %702 = vsyncadd (%p1033_p12), %s197_s5, 4294967040  ;;  %p1034_p5 = scmp.ne.s32.totalorder %s1023_s21, 0 }
  0x6f   : > { %704 = dma.done.wait (%p1034_p5), [#allocation6], 256  }
  0x70   : > { %706 = vsyncadd (%p1034_p5), [#allocation6], 4294967040  ;;  %v740_v0 = vmov 0.0|0.0   ;;  %vm741_vm0 = vmmov 0   ;;  %v742_v1 = vmov 0.0   ;;  %v743_v2 = vmov 0  }
  0x71   : > { %466 = vmatprep.subr.bf16.mxu0 %v740_v0  ;;  %463 = vmatprep.mubr.msk.f32.mxu0 %vm741_vm0, %v742_v1  ;;  %vm238_vm1 = vcmask 1043456   ;;  %v232_v3 = vld [vmem:[%s200_s7] sm:$0xff]  ;;  %v233_v4 = vld [vmem:[%s200_s7 + $0x8] sm:$0xf]  ;;  %vm744_vm2 = vmmov 1   ;;  %vm234_vm4 = vcmask 97280  }
  0x72   : > { %560 = vset.pattern.permute.xlu0 %v743_v2  ;;  %vm468_vm3 = vmpackc.low %vm238_vm1, %vm744_vm2  ;;  %v467_v5 = vpack.c.bf16 %v233_v4, %v232_v3  ;;  %v312_v6 = vld [vmem:[#allocation7] sm:$0xff]  ;;  %v231_v7 = vld [vmem:[#allocation5] sm:$0xff]  ;;  %s448_s21 = sshll.u32 %s947_s6, 3  ;;  %s452_s23 = sshll.u32 %s725_s15, 7 }
  0x73   : > { %315 = vperm.xlu0 %560, %v312_v6   ;;  %s230_s26 = scalar_lea.vmem [#allocation8], %s448_s21  ;;  %s964_s28 = scalar_lea.hbm %s1016_s3, %s452_s23 }
  0x74   : > { %469 = vmatpush3.bf16.msk.msra.mxu0 %vm468_vm3, %v467_v5  ;;  %s335_s29 = sshll.u32 %s230_s26, 4  ;;  %s321_s20 = scalar_lea.sflag [#allocation4], %s947_s6  ;;  %s966_s29 = int_to_ptr.vmem [resolvable:$true] %s335_s29 }
  0x75   : > { %s647_s27 = scalar_lea.vmem %s966_s29, 128  ;;  %p1035_p10 = scmp.ne.s32.totalorder %s1026_s24, 0 }
  0x76   : > { %p648_p3 = scmp.ne.s32.totalorder %s966_s29, %s647_s27  ;;  %s745_s15 = smov [#allocation8]  }
  0x77   : > { %464 = vmatmul.mubr.msk.f32.vlgmr.msra.gmra.mrb[0].mxu0 %vm234_vm4, %v231_v7  ;;  %s651_s9 = sshll.u32 %s745_s15, 4  ;;  %s652_s9 = int_to_ptr.vmem [resolvable:$false] %s651_s9 }
  0x78   : > { %p649_p11 = pnand %p648_p3, %p1035_p10  ;;  %s653_s4 = scalar_lea.vmem %s652_s9, 256 }
  0x79   : > { %p654_p0 = scmp.lt.s32.totalorder %s966_s29, %s652_s9  ;;  %p655_p6 = scmp.lt.s32.totalorder %s653_s4, %s647_s27 }
  0x7a   : > { %p650_p1 = pneg %p649_p11 }
  0x7b   : > { %p656_p2 = por %p655_p6, %p654_p0 }
  0x7d   : > { %p657_p9 = pnand %p656_p2, %p650_p1 }
  0xf2   : > { %v316_v8 = vpop.permute.xlu0 %315 }
 0x14a   : > { %v308_v9 = vpop.f32.mrb[0].mxu0 }
 0x14b   : > { %v318_v10 = vmul.f32 %v316_v8, %v308_v9  ;;  %v465_v11 = vpop.f32.mrb[1].mxu0 }
 0x14d   : > { %319 = vst [vmem:[%s230_s26] sm:$0xff] %v318_v10 }
 0x14e   : > { %660 = shalt.err (!%p657_p9)
}
 0x14f   : > { %s661_s18 = scalar_lea.hbm %s964_s28, 128  ;;  %s665_s30 = scalar_lea.hbm %s1016_s3, 256 }
 0x150   : > { %p662_p8 = scmp.ne.s32.totalorder %s964_s28, %s661_s18  ;;  %p666_p7 = scmp.lt.u32.totalorder %s964_s28, %s1016_s3 }
 0x151   : > { %p667_p12 = scmp.lt.u32.totalorder %s665_s30, %s661_s18  ;;  %p669_p3 = scmp.lt.u32.totalorder %s661_s18, %s964_s28 }
 0x152   : > { %p663_p13 = pnand %p662_p8, %p1035_p10 }
 0x153   : > { %p668_p5 = por %p667_p12, %p666_p7 }
 0x154   : > { %p664_p4 = pneg %p663_p13 }
 0x155   : > { %p670_p11 = por %p669_p3, %p668_p5 }
 0x157   : > { %p671_p1 = pnand %p670_p11, %p664_p4 }
 0x159   : > { %674 = shalt.err (!%p671_p1)
}
 0x15a   : > { %480 = dma.vmem_to_hbm [thread:$0]  (%p1035_p10), %s966_s29, 128, %s964_s28, %s321_s20  }
 0x15b PF: > { %s347_s21 = sand.u32 1, %s713_s12   ;;  %p1036_p0 = scmp.ne.s32.totalorder %s1027_s25, 0 }
 0x15c   : > { %p1037_p6 = scmp.ge.s32.totalorder %s733_s17, 2  ;;  %s348_s23 = scalar_lea.sflag [#allocation4], %s347_s21 }
 0x15e   : > { %p494_p2 = pnand %p1037_p6, %p1036_p0 }
 0x160   : > { %708 = dma.done.wait (!%p494_p2), %s348_s23, 128  }
 0x161   : > { %710 = vsyncadd (!%p494_p2), %s348_s23, 4294967168  ;;  %s20_s17 = sadd.s32 1, %s733_s17   ;;  %s1038_s12 = smov %s717_s13 }
 0x162   : > { %p17_p9 = scmp.ge.s32.totalorder %s20_s17, 4   ;;  %s1039_s13 = smov %s721_s14 }
 0x163   : > { %s1040_s14 = smov %s914_s11  ;;  %s1041_s15 = smov %s729_s16 }
 0x164   : > { %s1042_s16 = smov %s1044_s22  ;;  %19 = sbr.rel (!%p17_p9) target bundleno = 7 (0x7), region = 85 }
 0x16b   :  { %353 = vsyncpa [#allocation3], 1 }
 0x16c   :  { %355 = vsyncpa [#allocation3 + $0x1], 1 }
 0x16d   :  { %356 = vsyncpa [#allocation6], 1 }
 0x16e   :  { %357 = vsyncpa [#allocation4], 1 }
 0x16f   :  { %359 = vsyncpa [#allocation4 + $0x1], 1 }

</bundles_post_ra>
